<compile_context>
chip_gen: v5e
topology: v5e:2x2
jax: 0.10.0
libtpu: 0.0.40
codegen_flags: <defaults>
</compile_context>

<pallas_src>
import functools

import jax
import jax.numpy as jnp
from jax.experimental import pallas as pl
from jax.experimental.pallas import tpu as pltpu

_NEG = -1e30  # "minus infinity" for padded vocab lanes (finite -> no inf-inf NaNs)


def _round_up(n, m):
    return ((n + m - 1) // m) * m


def _pick_tv(vp, hp, tb_max=256, budget=40 * 1024 * 1024):
    """Largest vocab tile whose double-buffered working set fits v7x's 64 MiB
    VMEM with headroom (v5e/v6e have 128 MiB, so anything passing fits there)."""
    for cand in (2048, 1024, 512, 256, 128):
        if cand > vp:
            continue
        ws = (2 * (hp * cand * 2          # bf16 weight tile
                   + tb_max * cand * 2    # bf16 logits tile
                   + 8 * cand * 4)        # f32 bias tile (sublane-padded)
              + 2 * tb_max * hp * 2)      # bf16 x tile
        if ws <= budget:
            return cand
    return 128


def _vmem_limit_bytes(tb, tv, hp, bp):
    est = (2 * tb * hp * 2        # x tile (bf16), double-buffered
           + 2 * hp * tv * 2      # weight tile (bf16)
           + 2 * 8 * tv * 4       # bias tile (f32, sublane-padded)
           + 2 * tb * tv * 2      # bf16 logits output tile
           + 2 * tb * 4 * 2       # lse output tile
           + 2 * bp * 4)          # running max / exp-sum scratch
    # Cap well below v7x's 64 MiB physical VMEM to leave compiler scratch
    # headroom (v5e / v6e have 128 MiB, so the cap is safe everywhere).
    return int(min(48 * 1024 * 1024, max(32 * 1024 * 1024, 2 * est)))


def _logits_lse_kernel(d_ref, x_ref, w_ref, b_ref, z_ref, lse_ref, m_ref, s_ref):
    """Weight-stationary sweep: vocab tiles on the OUTER grid axis.

    Grid = (nv, nb): j = vocab tile (outer, "arbitrary" reduction axis),
    i = batch tile (inner, "parallel").  The weight block's index depends only
    on (dict, j), so each (Hp, tv) weight slab is fetched from HBM once.

    d_ref  : (1,)         SMEM  active dict id (consumed by the index_maps)
    x_ref  : (tb, Hp)     VMEM  bf16 activations (zero-padded rows / cols)
    w_ref  : (Hp, tv)     VMEM  bf16 weight tile of the active dict
    b_ref  : (1, tv)      VMEM  f32 bias tile (-1e30 on padded vocab lanes)
    z_ref  : (tb, tv)     VMEM  bf16 raw-logits output tile
    lse_ref: (tb, 1)      VMEM  f32 per-row log-sum-exp (written on last j)
    m_ref, s_ref: (nb, tb, 1) f32 scratch -- per-batch-tile running max /
        rescaled exp-sum, persistent across the whole j sweep.
    """
    j = pl.program_id(0)
    i = pl.program_id(1)
    nv = pl.num_programs(0)
    tb = x_ref.shape[0]

    @pl.when(j == 0)
    def _():
        m_ref[i] = jnp.full((tb, 1), _NEG, dtype=jnp.float32)
        s_ref[i] = jnp.zeros((tb, 1), dtype=jnp.float32)

    # bf16 x bf16 -> f32 accumulation on the MXU; softmax statistics in f32.
    logits = jnp.dot(x_ref[...], w_ref[...], preferred_element_type=jnp.float32)
    logits = logits + b_ref[...]
    z_ref[...] = logits.astype(jnp.bfloat16)

    m_prev = m_ref[i]
    s_prev = s_ref[i]
    m_new = jnp.maximum(m_prev, jnp.max(logits, axis=-1, keepdims=True))
    s_new = s_prev * jnp.exp(m_prev - m_new) + jnp.sum(
        jnp.exp(logits - m_new), axis=-1, keepdims=True)
    m_ref[i] = m_new
    s_ref[i] = s_new

    @pl.when(j == nv - 1)
    def _():
        lse_ref[...] = m_new + jnp.log(s_new)


def _normalize_kernel(z_ref, lse_ref, o_ref):
    """log_softmax = logits - logsumexp; in-place (output aliases z), lane-dense."""
    o_ref[...] = (z_ref[...].astype(jnp.float32) - lse_ref[...]).astype(o_ref.dtype)


@functools.partial(jax.jit, static_argnames=("tv",))
def generator_forward(d, x, w, b, *, tv):
    """d: (1,) int32 active dict id; x: (B, H) f32;
    w: (num_dicts, Hp, Vp) bf16; b: (num_dicts, 1, Vp) f32.
    Returns the padded (Bp, Vp) bf16 log-prob slab; the caller slices
    [:B, :vocab_active] exactly once (no extra copies inside the jit)."""
    B, H = x.shape
    _, Hp, Vp = w.shape
    assert Vp % tv == 0 and Hp >= H

    # Batch tiling: 16-row granularity (bf16 packs 16 sublanes per vreg);
    # for 17 <= B <= 512 force nb == 2 so both v7x TensorCores get work.
    if B <= 16:
        tb = _round_up(max(B, 1), 16)
    elif B <= 512:
        tb = _round_up((B + 1) // 2, 16)
    else:
        tb = 256
    Bp = _round_up(B, tb)
    nb = Bp // tb
    nv = Vp // tv

    xb = x.astype(jnp.bfloat16)
    if Bp != B or Hp != H:
        xb = jnp.pad(xb, ((0, Bp - B), (0, Hp - H)))

    z, lse = pl.pallas_call(
        _logits_lse_kernel,
        out_shape=(
            jax.ShapeDtypeStruct((Bp, Vp), jnp.bfloat16),
            jax.ShapeDtypeStruct((Bp, 1), jnp.float32),
        ),
        grid_spec=pltpu.PrefetchScalarGridSpec(
            num_scalar_prefetch=1,
            grid=(nv, nb),          # vocab outer (weight-stationary), batch inner
            in_specs=[
                pl.BlockSpec((tb, Hp), lambda j, i, d_ref: (i, 0)),                  # x
                pl.BlockSpec((None, Hp, tv), lambda j, i, d_ref: (d_ref[0], 0, j)),  # W
                pl.BlockSpec((None, 1, tv), lambda j, i, d_ref: (d_ref[0], 0, j)),   # bias
            ],
            out_specs=[
                pl.BlockSpec((tb, tv), lambda j, i, d_ref: (i, j)),   # bf16 raw logits
                pl.BlockSpec((tb, 1), lambda j, i, d_ref: (i, 0)),    # lse (last j)
            ],
            scratch_shapes=[
                pltpu.VMEM((nb, tb, 1), jnp.float32),   # running max
                pltpu.VMEM((nb, tb, 1), jnp.float32),   # running exp-sum
            ],
        ),
        compiler_params=pltpu.CompilerParams(
            dimension_semantics=("arbitrary", "parallel"),
            vmem_limit_bytes=_vmem_limit_bytes(tb, tv, Hp, Bp),
        ),
    )(d, xb, w, b)

    # Normalize pass: large lane-dense tiles, in place on the bf16 logits slab.
    kmax = max(1, min(nv, 4096 // tv))
    k = 1
    for cand in range(kmax, 0, -1):
        if nv % cand == 0:
            k = cand
            break
    tvn = tv * k

    out = pl.pallas_call(
        _normalize_kernel,
        out_shape=jax.ShapeDtypeStruct((Bp, Vp), jnp.bfloat16),
        grid=(nb, Vp // tvn),
        in_specs=[
            pl.BlockSpec((tb, tvn), lambda i, j: (i, j)),
            pl.BlockSpec((tb, 1), lambda i, j: (i, 0)),
        ],
        out_specs=pl.BlockSpec((tb, tvn), lambda i, j: (i, j)),
        input_output_aliases={0: 0},   # subtract in place: no extra (Bp, Vp) buffer
        compiler_params=pltpu.CompilerParams(
            dimension_semantics=("parallel", "parallel"),
        ),
    )(z, lse)

    return out


class PallasGenerator:
    """Mirrors Generator(opt, dicts): one linear per target dict + LogSoftmax.

    switchID / MultiLinear bookkeeping is host-side parameter selection; here
    it just flips the scalar-prefetch dict id, so no recompilation happens.
    Log-probabilities are returned in bf16 (error below the bf16-weight noise
    floor); add .astype(float32) at the call site if f32 is required.
    """

    def __init__(self, rnn_size, vocab_sizes, key, tv=None):
        self.rnn_size = int(rnn_size)
        self.vocab_sizes = [int(v) for v in vocab_sizes]
        H = self.rnn_size
        num_dicts = len(self.vocab_sizes)

        # H is the lane dim of the x block and the K dim of the MXU: pad it to
        # a vreg/MXU-friendly multiple (256 on the 256-wide v6e/v7x MXUs).
        Hp = _round_up(H, 256) if H > 128 else _round_up(H, 128)
        self.h_padded = Hp

        vp0 = _round_up(max(self.vocab_sizes), 128)
        if tv is None:
            tv = _pick_tv(vp0, Hp)
        else:
            tv = min(_round_up(int(tv), 128), vp0)
        vp = _round_up(vp0, tv)
        self.tv = tv
        self.vocab_padded = vp

        w_stack = jnp.zeros((num_dicts, Hp, vp), jnp.bfloat16)
        b_stack = jnp.full((num_dicts, 1, vp), _NEG, jnp.float32)
        self.ref_w, self.ref_b = [], []
        bound = 1.0 / (H ** 0.5)              # nn.Linear uniform(-1/sqrt(H), 1/sqrt(H))
        for i, v in enumerate(self.vocab_sizes):
            kw, kb, key = jax.random.split(key, 3)
            w_pt = jax.random.uniform(kw, (v, H), jnp.float32,
                                      minval=-bound, maxval=bound)  # PyTorch (out,in)
            b_pt = jax.random.uniform(kb, (v,), jnp.float32,
                                      minval=-bound, maxval=bound)
            w_bf = w_pt.T.astype(jnp.bfloat16)                      # (H, V) bf16
            w_stack = w_stack.at[i, :H, :v].set(w_bf)
            b_stack = b_stack.at[i, 0, :v].set(b_pt)
            self.ref_w.append(w_bf.astype(jnp.float32))
            self.ref_b.append(b_pt)
        # TODO(synk): int8 (v5e/v6e) / fp8 (v7x) weight quantization with a
        # per-column scale folded into the bias would halve the dominant HBM
        # weight stream for decode-sized batches.
        self.w_stack = w_stack
        self.b_stack = b_stack
        self.active = 0
        self._active_arr = jnp.zeros((1,), jnp.int32)

    def switchID(self, tgt_id):
        self.active = int(tgt_id)
        self._active_arr = jnp.array([self.active], jnp.int32)

    def __call__(self, x):
        full = generator_forward(self._active_arr, x, self.w_stack, self.b_stack,
                                 tv=self.tv)
        # Single fused un-pad + active-vocab slice on the padded slab.
        return full[:x.shape[0], : self.vocab_sizes[self.active]]


if __name__ == "__main__":
    key = jax.random.PRNGKey(0)
    k_in, k_params = jax.random.split(key)

    batch = 20                 # not a multiple of 16 -> exercises batch padding
    rnn_size = 32              # opt.rnn_size (padded to 128 internally)
    vocab_sizes = [128, 200]   # 200 not a multiple of 128 -> exercises lane masking

    # tv=128 at these toy sizes so the online-LSE path runs over 2 vocab tiles.
    gen = PallasGenerator(rnn_size, vocab_sizes, k_params, tv=128)
    x = jax.random.normal(k_in, (batch, rnn_size), jnp.float32)

    out0 = jax.block_until_ready(gen(x))      # dict 0
    gen.switchID(1)
    out1 = jax.block_until_ready(gen(x))      # dict 1 (same compiled kernel)

    # Pure-JAX reference on the same (bf16-rounded) parameters.
    def ref(xv, w, b):
        xb = xv.astype(jnp.bfloat16).astype(jnp.float32)
        return jax.nn.log_softmax(xb @ w + b[None, :], axis=-1)

    r0 = ref(x, gen.ref_w[0], gen.ref_b[0])
    r1 = ref(x, gen.ref_w[1], gen.ref_b[1])

    o0 = out0.astype(jnp.float32)
    o1 = out1.astype(jnp.float32)

    assert out0.shape == (batch, vocab_sizes[0])
    assert out1.shape == (batch, vocab_sizes[1])
    assert float(jnp.max(jnp.abs(o0 - r0))) < 5e-2
    assert float(jnp.max(jnp.abs(o1 - r1))) < 5e-2
    # Log-softmax rows must exponentiate-sum to 1 over the real vocab lanes
    # (bf16 log-probs -> slightly looser tolerance than an f32 output).
    assert float(jnp.max(jnp.abs(jnp.sum(jnp.exp(o0), axis=-1) - 1.0))) < 3e-2
    assert float(jnp.max(jnp.abs(jnp.sum(jnp.exp(o1), axis=-1) - 1.0))) < 3e-2

    print("KERNEL_OK")
</pallas_src>

<mosaic_0001>
module attributes {stable_mosaic.version = 11 : i64} {
  func.func @_normalize_kernel(%arg0: i32, %arg1: i32, %arg2: memref<16x256xbf16, #tpu.memory_space<vmem>>, %arg3: memref<16x1xf32, #tpu.memory_space<vmem>>, %arg4: memref<16x256xbf16, #tpu.memory_space<vmem>>) attributes {dimension_semantics = [#tpu.dimension_semantics<parallel>, #tpu.dimension_semantics<parallel>], iteration_bounds = array<i64: 2, 1>, scalar_prefetch = 0 : i64, scratch_operands = 0 : i64, tpu.core_type = #tpu.core_type<tc>, window_params = [{transform_indices = @transform_0, window_bounds = array<i64: 16, 256>}, {transform_indices = @transform_1, window_bounds = array<i64: 16, 1>}, {transform_indices = @transform_2, window_bounds = array<i64: 16, 256>}]} {
    %c0 = arith.constant 0 : index
    %c0_0 = arith.constant 0 : index
    %0 = vector.load %arg2[%c0, %c0_0] : memref<16x256xbf16, #tpu.memory_space<vmem>>, vector<16x256xbf16>
    %1 = arith.extf %0 : vector<16x256xbf16> to vector<16x256xf32>
    %c0_1 = arith.constant 0 : index
    %c0_2 = arith.constant 0 : index
    %2 = vector.load %arg3[%c0_1, %c0_2] : memref<16x1xf32, #tpu.memory_space<vmem>>, vector<16x1xf32>
    %3 = vector.broadcast %2 : vector<16x1xf32> to vector<16x256xf32>
    %4 = arith.subf %1, %3 : vector<16x256xf32>
    %5 = arith.truncf %4 : vector<16x256xf32> to vector<16x256xbf16>
    %c0_3 = arith.constant 0 : index
    %c0_4 = arith.constant 0 : index
    %6 = vector.load %arg4[%c0_3, %c0_4] : memref<16x256xbf16, #tpu.memory_space<vmem>>, vector<16x256xbf16>
    tpu.vector_store %arg4[%c0_3, %c0_4], %5 {strides = array<i32>} : memref<16x256xbf16, #tpu.memory_space<vmem>>, vector<16x256xbf16>,
    return
  }
  func.func @transform_0(%arg0: i32, %arg1: i32) -> (i32, i32) {
    %c0_i32 = arith.constant 0 : i32
    return %arg0, %arg1 : i32, i32
  }
  func.func @transform_1(%arg0: i32, %arg1: i32) -> (i32, i32) {
    %c0_i32 = arith.constant 0 : i32
    %c0_i32_0 = arith.constant 0 : i32
    return %arg0, %c0_i32 : i32, i32
  }
  func.func @transform_2(%arg0: i32, %arg1: i32) -> (i32, i32) {
    %c0_i32 = arith.constant 0 : i32
    return %arg0, %arg1 : i32, i32
  }
}

module attributes {stable_mosaic.version = 11 : i64} {
  func.func @_logits_lse_kernel(%arg0: i32, %arg1: i32, %arg2: memref<1xi32, #tpu.memory_space<smem>>, %arg3: memref<16x128xbf16, #tpu.memory_space<vmem>>, %arg4: memref<1x128x128xbf16, #tpu.memory_space<vmem>>, %arg5: memref<1x1x128xf32, #tpu.memory_space<vmem>>, %arg6: memref<16x128xbf16, #tpu.memory_space<vmem>>, %arg7: memref<16x1xf32, #tpu.memory_space<vmem>>, %arg8: memref<2x16x1xf32, #tpu.memory_space<vmem>>, %arg9: memref<2x16x1xf32, #tpu.memory_space<vmem>>) attributes {dimension_semantics = [#tpu.dimension_semantics<arbitrary>, #tpu.dimension_semantics<parallel>], iteration_bounds = array<i64: 2, 2>, scalar_prefetch = 1 : i64, scratch_operands = 2 : i64, tpu.core_type = #tpu.core_type<tc>, window_params = [{transform_indices = @transform_0, window_bounds = array<i64: 16, 128>}, {transform_indices = @transform_1, window_bounds = array<i64: 1, 128, 128>}, {transform_indices = @transform_2, window_bounds = array<i64: 1, 1, 128>}, {transform_indices = @transform_3, window_bounds = array<i64: 16, 128>}, {transform_indices = @transform_4, window_bounds = array<i64: 16, 1>}]} {
    %c0_i32 = arith.constant 0 : i32
    %0 = arith.cmpi eq, %arg0, %c0_i32 : i32
    %1 = arith.extui %0 : i1 to i32
    %c0_i32_0 = arith.constant 0 : i32
    %2 = arith.cmpi ne, %1, %c0_i32_0 : i32
    scf.if %2 {
      %cst_21 = arith.constant -1.000000e+30 : f32
      %42 = vector.broadcast %cst_21 : f32 to vector<16x1xf32>
      %43 = arith.index_cast %arg1 : i32 to index
      %c0_22 = arith.constant 0 : index
      %c0_23 = arith.constant 0 : index
      %44 = vector.load %arg8[%43, %c0_22, %c0_23] : memref<2x16x1xf32, #tpu.memory_space<vmem>>, vector<1x16x1xf32>
      %45 = vector.shape_cast %44 : vector<1x16x1xf32> to vector<16x1xf32>
      %46 = vector.shape_cast %42 : vector<16x1xf32> to vector<1x16x1xf32>
      tpu.vector_store %arg8[%43, %c0_22, %c0_23], %46 {strides = array<i32>} : memref<2x16x1xf32, #tpu.memory_space<vmem>>, vector<1x16x1xf32>,
      %cst_24 = arith.constant 0.000000e+00 : f32
      %47 = vector.broadcast %cst_24 : f32 to vector<16x1xf32>
      %48 = arith.index_cast %arg1 : i32 to index
      %c0_25 = arith.constant 0 : index
      %c0_26 = arith.constant 0 : index
      %49 = vector.load %arg9[%48, %c0_25, %c0_26] : memref<2x16x1xf32, #tpu.memory_space<vmem>>, vector<1x16x1xf32>
      %50 = vector.shape_cast %49 : vector<1x16x1xf32> to vector<16x1xf32>
      %51 = vector.shape_cast %47 : vector<16x1xf32> to vector<1x16x1xf32>
      tpu.vector_store %arg9[%48, %c0_25, %c0_26], %51 {strides = array<i32>} : memref<2x16x1xf32, #tpu.memory_space<vmem>>, vector<1x16x1xf32>,
    } else {
    }
    %c0 = arith.constant 0 : index
    %c0_1 = arith.constant 0 : index
    %3 = vector.load %arg3[%c0, %c0_1] : memref<16x128xbf16, #tpu.memory_space<vmem>>, vector<16x128xbf16>
    %c0_2 = arith.constant 0 : index
    %c0_3 = arith.constant 0 : index
    %c0_4 = arith.constant 0 : index
    %4 = vector.load %arg4[%c0_2, %c0_3, %c0_4] : memref<1x128x128xbf16, #tpu.memory_space<vmem>>, vector<1x128x128xbf16>
    %5 = vector.shape_cast %4 : vector<1x128x128xbf16> to vector<128x128xbf16>
    %cst = arith.constant dense<0.000000e+00> : vector<16x128xf32>
    %6 = tpu.matmul %3, %5, %cst {dimension_numbers = #tpu.dot_dimension_numbers<[1], [0], [0], [1], [0, 0, 1, 1], [], []>} : vector<16x128xbf16>, vector<128x128xbf16>, vector<16x128xf32> -> vector<16x128xf32>
    %c0_5 = arith.constant 0 : index
    %c0_6 = arith.constant 0 : index
    %c0_7 = arith.constant 0 : index
    %7 = vector.load %arg5[%c0_5, %c0_6, %c0_7] : memref<1x1x128xf32, #tpu.memory_space<vmem>>, vector<1x1x128xf32>
    %8 = vector.shape_cast %7 : vector<1x1x128xf32> to vector<1x128xf32>
    %9 = vector.broadcast %8 : vector<1x128xf32> to vector<16x128xf32>
    %10 = arith.addf %6, %9 : vector<16x128xf32>
    %11 = arith.truncf %10 : vector<16x128xf32> to vector<16x128xbf16>
    %c0_8 = arith.constant 0 : index
    %c0_9 = arith.constant 0 : index
    %12 = vector.load %arg6[%c0_8, %c0_9] : memref<16x128xbf16, #tpu.memory_space<vmem>>, vector<16x128xbf16>
    tpu.vector_store %arg6[%c0_8, %c0_9], %11 {strides = array<i32>} : memref<16x128xbf16, #tpu.memory_space<vmem>>, vector<16x128xbf16>,
    %13 = arith.index_cast %arg1 : i32 to index
    %c0_10 = arith.constant 0 : index
    %c0_11 = arith.constant 0 : index
    %14 = vector.load %arg8[%13, %c0_10, %c0_11] : memref<2x16x1xf32, #tpu.memory_space<vmem>>, vector<1x16x1xf32>
    %15 = vector.shape_cast %14 : vector<1x16x1xf32> to vector<16x1xf32>
    %16 = arith.index_cast %arg1 : i32 to index
    %c0_12 = arith.constant 0 : index
    %c0_13 = arith.constant 0 : index
    %17 = vector.load %arg9[%16, %c0_12, %c0_13] : memref<2x16x1xf32, #tpu.memory_space<vmem>>, vector<1x16x1xf32>
    %18 = vector.shape_cast %17 : vector<1x16x1xf32> to vector<16x1xf32>
    %cst_14 = arith.constant dense<0xFF800000> : vector<16xf32>
    %19 = vector.multi_reduction <maximumf>, %10, %cst_14 [1] : vector<16x128xf32> to vector<16xf32>
    %20 = vector.shape_cast %19 : vector<16xf32> to vector<16x1xf32>
    %21 = arith.maximumf %15, %20 : vector<16x1xf32>
    %22 = arith.subf %15, %21 : vector<16x1xf32>
    %23 = math.exp %22 : vector<16x1xf32>
    %24 = arith.mulf %18, %23 : vector<16x1xf32>
    %25 = vector.broadcast %21 : vector<16x1xf32> to vector<16x128xf32>
    %26 = arith.subf %10, %25 : vector<16x128xf32>
    %27 = math.exp %26 : vector<16x128xf32>
    %cst_15 = arith.constant dense<0.000000e+00> : vector<16xf32>
    %28 = vector.multi_reduction <add>, %27, %cst_15 [1] : vector<16x128xf32> to vector<16xf32>
    %29 = vector.shape_cast %28 : vector<16xf32> to vector<16x1xf32>
    %30 = arith.addf %24, %29 : vector<16x1xf32>
    %31 = arith.index_cast %arg1 : i32 to index
    %c0_16 = arith.constant 0 : index
    %c0_17 = arith.constant 0 : index
    %32 = vector.load %arg8[%31, %c0_16, %c0_17] : memref<2x16x1xf32, #tpu.memory_space<vmem>>, vector<1x16x1xf32>
    %33 = vector.shape_cast %32 : vector<1x16x1xf32> to vector<16x1xf32>
    %34 = vector.shape_cast %21 : vector<16x1xf32> to vector<1x16x1xf32>
    tpu.vector_store %arg8[%31, %c0_16, %c0_17], %34 {strides = array<i32>} : memref<2x16x1xf32, #tpu.memory_space<vmem>>, vector<1x16x1xf32>,
    %35 = arith.index_cast %arg1 : i32 to index
    %c0_18 = arith.constant 0 : index
    %c0_19 = arith.constant 0 : index
    %36 = vector.load %arg9[%35, %c0_18, %c0_19] : memref<2x16x1xf32, #tpu.memory_space<vmem>>, vector<1x16x1xf32>
    %37 = vector.shape_cast %36 : vector<1x16x1xf32> to vector<16x1xf32>
    %38 = vector.shape_cast %30 : vector<16x1xf32> to vector<1x16x1xf32>
    tpu.vector_store %arg9[%35, %c0_18, %c0_19], %38 {strides = array<i32>} : memref<2x16x1xf32, #tpu.memory_space<vmem>>, vector<1x16x1xf32>,
    %c1_i32 = arith.constant 1 : i32
    %39 = arith.cmpi eq, %arg0, %c1_i32 : i32
    %40 = arith.extui %39 : i1 to i32
    %c0_i32_20 = arith.constant 0 : i32
    %41 = arith.cmpi ne, %40, %c0_i32_20 : i32
    scf.if %41 {
      %42 = math.log %30 : vector<16x1xf32>
      %43 = arith.addf %21, %42 : vector<16x1xf32>
      %c0_21 = arith.constant 0 : index
      %c0_22 = arith.constant 0 : index
      %44 = vector.load %arg7[%c0_21, %c0_22] : memref<16x1xf32, #tpu.memory_space<vmem>>, vector<16x1xf32>
      tpu.vector_store %arg7[%c0_21, %c0_22], %43 {strides = array<i32>} : memref<16x1xf32, #tpu.memory_space<vmem>>, vector<16x1xf32>,
    } else {
    }
    return
  }
  func.func @transform_0(%arg0: i32, %arg1: i32, %arg2: memref<1xi32, #tpu.memory_space<smem>>) -> (i32, i32) {
    %c0_i32 = arith.constant 0 : i32
    %c0_i32_0 = arith.constant 0 : i32
    return %arg1, %c0_i32 : i32, i32
  }
  func.func @transform_1(%arg0: i32, %arg1: i32, %arg2: memref<1xi32, #tpu.memory_space<smem>>) -> (i32, i32, i32) {
    %c0 = arith.constant 0 : index
    %0 = memref.load %arg2[%c0] : memref<1xi32, #tpu.memory_space<smem>>
    %c0_i32 = arith.constant 0 : i32
    %c0_i32_0 = arith.constant 0 : i32
    return %0, %c0_i32, %arg0 : i32, i32, i32
  }
  func.func @transform_2(%arg0: i32, %arg1: i32, %arg2: memref<1xi32, #tpu.memory_space<smem>>) -> (i32, i32, i32) {
    %c0 = arith.constant 0 : index
    %0 = memref.load %arg2[%c0] : memref<1xi32, #tpu.memory_space<smem>>
    %c0_i32 = arith.constant 0 : i32
    %c0_i32_0 = arith.constant 0 : i32
    return %0, %c0_i32, %arg0 : i32, i32, i32
  }
  func.func @transform_3(%arg0: i32, %arg1: i32, %arg2: memref<1xi32, #tpu.memory_space<smem>>) -> (i32, i32) {
    %c0_i32 = arith.constant 0 : i32
    return %arg1, %arg0 : i32, i32
  }
  func.func @transform_4(%arg0: i32, %arg1: i32, %arg2: memref<1xi32, #tpu.memory_space<smem>>) -> (i32, i32) {
    %c0_i32 = arith.constant 0 : i32
    %c0_i32_0 = arith.constant 0 : i32
    return %arg1, %c0_i32 : i32, i32
  }
}

</mosaic_0001>

<bundles_post_ra>
// kernel: generator_forward.3
= control target key start
LH: loop header
LB: loop body
LE: loop exit
PB: predicated region body
PF: predicated region fallthrough
CT: control target
= control target key end

     0   :  { %7 = vsyncpa [#allocation3], 0  ;;  %s702_s0 = inlined_call_operand.hbm [shape: bf16[32,256], index: 0, kind: input, shape index: {}, may-alias: {0,2}]   ;;  %s703_s1 = inlined_call_operand.vmem [shape: f32[32,1], index: 1, kind: input, shape index: {}]   ;;  %s704_s2 = inlined_call_operand.hbm [shape: bf16[32,256], index: 2, kind: output, shape index: {}, may-alias: {0,2}]  }
   0x1   :  { %9 = vsyncpa [#allocation3 + $0x1], 0 }
   0x2   :  { %10 = vsyncpa [#allocation4], 0 }
   0x3   :  { %12 = vsyncpa [#allocation4 + $0x1], 0  ;;  %s578_s9 = smov 0   ;;  %s580_s10 = smov 0  }
   0x4   :  { %s582_s11 = smov 0   ;;  %s584_s12 = smov 0  }
   0x5   :  { %s586_s13 = smov 0   ;;  %s588_s14 = smov 0  }
   0x6 LB: > { %s353_s15 = sadd.s32 4294967295, %s556_s14   ;;  %s354_s16 = sadd.s32 4294967294, %s556_s14   ;;  %s556_s14 = sphi %s588_s14, %s18_s14   ;;  %s552_s13 = sphi %s586_s13, %s713_s13   ;;  %s548_s12 = sphi %s584_s12, %s712_s12   ;;  %s544_s11 = sphi %s582_s11, %s711_s11   ;;  %s540_s10 = sphi %s580_s10, %s710_s10   ;;  %s536_s9 = sphi %s578_s9, %s709_s9  }
   0x7   : > { %s30_s17 = sadd.s32 1, %s552_s13  ;;  %s39_s18 = sadd.s32 1, %s544_s11 }
   0x8   : > { %p32_p0 = scmp.ge.s32.totalorder %s30_s17, 2  ;;  %p46_p1 = scmp.ne.s32.totalorder %s544_s11, %s540_s10 }
   0x9   : > { %p47_p2 = scmp.eq.s32.totalorder %s556_s14, 0  ;;  %p52_p3 = scmp.ne.s32.totalorder %s540_s10, %s536_s9 }
   0xa   : > { %s715_s17 = smov (%p32_p0, %s30_s17), 0  ;;  %p53_p5 = scmp.eq.s32.totalorder %s353_s15, 0 }
   0xb   : > { %p619_p4 = por %p47_p2, %p46_p1  ;;  %s34_s20 = ssub.s32 %s552_s13, %s715_s17 }
   0xc   : > { %p104_p6 = scmp.eq.s32.totalorder %s353_s15, 1  ;;  %p37_p7 = scmp.eq.s32.totalorder %s34_s20, 0 }
   0xd   : > { %p625_p8 = por %p53_p5, %p52_p3  ;;  %p110_p10 = scmp.eq.s32.totalorder %s354_s16, 1 }
   0xe   : > { %p629_p9 = por %p104_p6, %p46_p1  ;;  %p356_p12 = scmp.ge.s32.totalorder %s556_s14, 2 }
   0xf   : > { %s634_s23 = scalar_select %p37_p7, %s544_s11, %s39_s18  }
  0x10   : > { %p636_p11 = por %p110_p10, %p52_p3  ;;  %p388_p13 = scmp.lt.s32.totalorder %s556_s14, 2 }
  0x11   : > { %s130_s25 = sand.u32 1, %s544_s11   ;;  %s373_s27 = sshll.u32 %s552_s13, 4 }
  0x12   : > { %s357_s26 = sshll.u32 %s130_s25, 4  ;;  %s142_s30 = scalar_lea.hbm %s702_s0, %s373_s27 }
  0x13   : > { %s134_s3 = scalar_lea.vmem [#allocation2], %s357_s26  ;;  %s143_s5 = sshll.u32 %s142_s30, 4  ;;  %s144_s5 = int_to_ptr.hbm [resolvable:$true] %s143_s5 }
  0x14   : > { %s145_s4 = sshll.u32 %s134_s3, 4  ;;  %p381_p0 = pnand %p388_p13, %p619_p4  ;;  %s146_s4 = int_to_ptr.vmem [resolvable:$true] %s145_s4 }
  0x15   : > { %p361_p1 = scmp.ge.s32.totalorder %s556_s14, 1  ;;  %s131_s6 = scalar_lea.sflag [#allocation3], %s130_s25 }
  0x16   : > { %s558_s7 = smov 128   ;;  %s559_s8 = smov 8  }
  0x17   : > { %383 = dma.hbm_to_vmem [thread:$0]  (!%p381_p0), %s144_s5, 256, %s146_s4, %s131_s6, %s558_s7, %s558_s7, %s559_s8  }
  0x18   : > { %p162_p2 = scmp.lt.s32.totalorder %s556_s14, 3 }
  0x1a   : > { %p163_p3 = pnand %p361_p1, %p162_p2 }
  0x1b   : > { %s652_s15 = sand.u32 (!%p163_p3), 1, %s540_s10  }
  0x1c   : > { %166 = sbr.rel (%p163_p3) target bundleno = 172 (0xac), region = 28  ;;  %s362_s16 = sshll.u32 (!%p163_p3), %s652_s15, 4 }
  0x1d   : > { %s169_s18 = scalar_lea.sflag (!%p163_p3), [#allocation3], %s652_s15  ;;  %s172_s20 = scalar_lea.vmem (!%p163_p3), [#allocation2], %s362_s16 }
  0x21   : > { %527 = dma.done.wait (%p625_p8), %s169_s18, 256  }
  0x22   : > { %529 = vsyncadd (%p625_p8), %s169_s18, 4294967040  ;;  %s364_s19 = sshll.u32 %s548_s12, 1  ;;  %v560_v0 = vmov 0   ;;  %v209_v3 = vld [vmem:[%s172_s20] sm:$0xff]  ;;  %s375_s21 = sshll.u32 %s548_s12, 4  ;;  %v210_v9 = vld [vmem:[%s172_s20 + $0x8] sm:$0xff] }
  0x23   : > { %443 = vset.pattern.permute.xlu0 %v560_v0  ;;  %p202_p4 = scmp.lt.s32.totalorder %s364_s19, 3  ;;  %v211_v4 = vunpack.c.l.bf16 %v209_v3  ;;  %v212_v5 = vunpack.c.h.bf16 %v209_v3  ;;  %s250_s3 = scalar_lea.hbm %s704_s2, %s375_s21  ;;  %v213_v11 = vunpack.c.l.bf16 %v210_v9  ;;  %v214_v12 = vunpack.c.h.bf16 %v210_v9 }
  0x24   : > { %s198_s4 = scalar_lea.vmem [#allocation5], %s362_s16  ;;  %s253_s6 = sshll.u32 %s250_s3, 4  ;;  %s254_s6 = int_to_ptr.hbm [resolvable:$true] %s253_s6 }
  0x25   : > { %s717_s19 = smov (!%p202_p4, %s364_s19), 3  ;;  %s251_s5 = sshll.u32 %s198_s4, 4  ;;  %s252_s5 = int_to_ptr.vmem [resolvable:$true] %s251_s5 }
  0x26   : > { %s365_s25 = sshll.u32 %s717_s19, 3  ;;  %s236_s12 = scalar_lea.sflag [#allocation4], %s652_s15 }
  0x27   : > { %s205_s28 = scalar_lea.vmem %s703_s1, %s365_s25  ;;  %s488_s7 = sshra.s32 %s254_s6, 4  ;;  %s489_s7 = int_to_ptr.hbm [resolvable:$true] %s488_s7 }
  0x28   : > { %v215_v1 = vld [vmem:[%s205_s28] sm:$0xff]  ;;  %v216_v2 = vld [vmem:[%s205_s28 + $0x8] sm:$0xff]  ;;  %s490_s8 = scalar_lea.hbm %s489_s7, 16  ;;  %s494_s20 = scalar_lea.hbm %s704_s2, 32 }
  0x29   : > { %219 = vperm.xlu0 %443, %v215_v1   ;;  %p491_p5 = scmp.ne.s32.totalorder %s489_s7, %s490_s8  ;;  %p495_p8 = scmp.lt.s32.totalorder %s489_s7, %s704_s2 }
  0x2a   : > { %p496_p10 = scmp.lt.s32.totalorder %s494_s20, %s490_s8 }
  0x2b   : > { %p492_p6 = pnand %p491_p5, %p629_p9 }
  0x2c   : > { %p497_p13 = por %p496_p10, %p495_p8 }
  0x2d   : > { %p493_p7 = pneg %p492_p6 }
  0x2f   : > { %p498_p0 = pnand %p497_p13, %p493_p7 }
  0x31   : > { %224 = vperm.xlu0 %443, %v216_v2  }
  0x9b   : > { %v220_v6 = vpop.permute.xlu0 %219 }
  0x9c   : > { %v227_v7 = vsub.f32 %v211_v4, %v220_v6  ;;  %v228_v8 = vsub.f32 %v212_v5, %v220_v6 }
  0x9e   : > { %v231_v10 = vpack.c.bf16 %v228_v8, %v227_v7 }
  0xa0   : > { %233 = vst [vmem:[%s198_s4] sm:$0xff] %v231_v10 }
  0xa3   : > { %v225_v13 = vpop.permute.xlu0 %224 }
  0xa4   : > { %v229_v14 = vsub.f32 %v213_v11, %v225_v13  ;;  %v230_v15 = vsub.f32 %v214_v12, %v225_v13 }
  0xa6   : > { %v232_v16 = vpack.c.bf16 %v230_v15, %v229_v14 }
  0xa8   : > { %234 = vst [vmem:[%s198_s4 + $0x8] sm:$0xff] %v232_v16 }
  0xa9   : > { %501 = shalt.err (!%p498_p0)
}
  0xaa   : > { %s561_s15 = smov 128   ;;  %s562_s26 = smov 8  }
  0xab   : > { %378 = dma.vmem_to_hbm [thread:$0]  (%p629_p9), %s252_s5, 256, %s254_s6, %s236_s12, %s561_s15, %s561_s15, %s562_s26  }
  0xac PF: > { %s268_s27 = sand.u32 1, %s536_s9   ;;  %p385_p1 = pnand %p356_p12, %p636_p11 }
  0xad   : > { %s269_s28 = scalar_lea.sflag [#allocation4], %s268_s27 }
  0xae   : > { %p386_p2 = pneg %p385_p1 }
  0xb0   : > { %531 = dma.done.wait (%p386_p2), %s269_s28, 256  }
  0xb1   : > { %533 = vsyncadd (%p386_p2), %s269_s28, 4294967040  ;;  %s18_s14 = sadd.s32 1, %s556_s14   ;;  %s709_s9 = smov %s540_s10 }
  0xb2   : > { %p15_p3 = scmp.ge.s32.totalorder %s18_s14, 4   ;;  %s710_s10 = smov %s544_s11 }
  0xb3   : > { %s711_s11 = smov %s634_s23  ;;  %s712_s12 = smov %s552_s13 }
  0xb4   : > { %s713_s13 = smov %s715_s17  ;;  %17 = sbr.rel (!%p15_p3) target bundleno = 6 (0x6), region = 76 }
  0xb9   :  { %275 = vsyncpa [#allocation3], 1 }
  0xba   :  { %277 = vsyncpa [#allocation3 + $0x1], 1 }
  0xbb   :  { %278 = vsyncpa [#allocation4], 1 }
  0xbc   :  { %280 = vsyncpa [#allocation4 + $0x1], 1 }

// kernel: generator_forward.2
= control target key start
LH: loop header
LB: loop body
LE: loop exit
PB: predicated region body
PF: predicated region fallthrough
CT: control target
= control target key end

     0   :  { %s1302_s0 = inlined_call_operand.<no memory space> [shape: s32[1], index: 0, kind: input, shape index: {}]   ;;  %s1303_s1 = inlined_call_operand.vmem [shape: bf16[32,128], index: 1, kind: input, shape index: {}]   ;;  %s1304_s2 = inlined_call_operand.hbm [shape: bf16[2,128,256], index: 2, kind: input, shape index: {}]   ;;  %s1305_s3 = inlined_call_operand.vmem [shape: f32[2,1,256], index: 3, kind: input, shape index: {}]   ;;  %s1306_s4 = inlined_call_operand.hbm [shape: bf16[32,256], index: 4, kind: output, shape index: {0}]   ;;  %s1307_s5 = inlined_call_operand.vmem [shape: f32[32,1], index: 5, kind: output, shape index: {1}]  }
   0x1   :  { %1315 = sst [smem:[#allocation19_spill]] %s1304_s2 }
   0x2   :  { %11 = sst [smem:[#allocation5]] %s1302_s0 }
   0x3   :  { %12 = vsyncpa [#allocation7], 0 }
   0x4   :  { %14 = vsyncpa [#allocation7 + $0x1], 0 }
   0x5   :  { %15 = vsyncpa [#allocation8], 0 }
   0x6   :  { %17 = vsyncpa [#allocation8 + $0x1], 0  ;;  %s1052_s20 = smov 0   ;;  %s1054_s21 = smov 0  }
   0x7   :  { %s1056_s22 = smov 0   ;;  %s1058_s23 = smov 0  }
   0x8   :  { %s1060_s24 = smov 0   ;;  %s1062_s25 = smov 0  }
   0x9   :  { %s1064_s26 = smov 0   ;;  %s1066_s27 = smov 0  }
   0xa   :  { %s1068_s0 = smov 0   ;;  %s1070_s28 = smov 0  }
   0xb   :  { %s1072_s29 = smov 0  }
   0xc LB: > { %1316 = sst [smem:[#allocation12_spill]] %s984_s24  ;;  %s654_s30 = sadd.s32 4294967295, %s1008_s29   ;;  %s1008_s29 = sphi %s1072_s29, %s23_s29   ;;  %s1004_s28 = sphi %s1070_s28, %s1336_s28   ;;  %s1000_s0 = sphi %s1068_s0, %s1335_s0   ;;  %s996_s27 = sphi %s1066_s27, %s1334_s27   ;;  %s992_s26 = sphi %s1064_s26, %s1333_s26   ;;  %s988_s25 = sphi %s1062_s25, %s1332_s25   ;;  %s984_s24 = sphi %s1060_s24, %s1331_s24   ;;  %s980_s23 = sphi %s1058_s23, %s1330_s23   ;;  %s976_s22 = sphi %s1056_s22, %s1339_s22   ;;  %s972_s21 = sphi %s1054_s21, %s1338_s21   ;;  %s968_s20 = sphi %s1052_s20, %s1337_s20  }
   0xd   : > { %1317 = sst [smem:[#allocation13_spill]] %s988_s25  ;;  %s655_s6 = sadd.s32 4294967294, %s1008_s29  }
   0xe   : > { %1318 = sst [smem:[#allocation14_spill]] %s1000_s0  ;;  %s32_s7 = sadd.s32 1, %s1000_s0 }
   0xf   : > { %1319 = sst [smem:[#allocation15_spill]] %s1004_s28  ;;  %s35_s8 = sadd.s32 1, %s1004_s28 }
  0x10   : > { %p33_p0 = scmp.ge.s32.totalorder %s32_s7, 2  ;;  %s1109_s9 = sld [smem:[#allocation5]] }
  0x11   : > { %s72_s10 = sadd.s32 1, %s988_s25  ;;  %p79_p1 = scmp.ne.s32.totalorder %s988_s25, %s984_s24 }
  0x12   : > { %s1341_s7 = smov (%p33_p0, %s32_s7), 0  ;;  %s1343_s8 = smov (!%p33_p0, %s35_s8), %s1004_s28 }
  0x13   : > { %1320 = sst [smem:[#allocation16_spill]] %s1341_s7  ;;  %p80_p2 = scmp.eq.s32.totalorder %s1008_s29, 0 }
  0x14   : > { %p85_p3 = scmp.ne.s32.totalorder %s984_s24, %s980_s23  ;;  %p37_p4 = scmp.ge.s32.totalorder %s1343_s8, 2 }
  0x15   : > { %p86_p5 = scmp.eq.s32.totalorder %s654_s30, 0  ;;  %p1119_p6 = por %p80_p2, %p79_p1 }
  0x16   : > { %s1345_s8 = smov (%p37_p4, %s1343_s8), 0  ;;  %s125_s13 = ssub.s32 %s1000_s0, %s1341_s7 }
  0x17   : > { %1322 = sst [smem:[#allocation17_spill]] %s1345_s8  ;;  %p1125_p7 = por %p86_p5, %p85_p3 }
  0x18   : > { %s68_s14 = ssub.s32 %s1004_s28, %s1345_s8  ;;  %s130_s15 = sadd.s32 1, %s976_s22 }
  0x19   : > { %s127_s16 = sor.u32 %s125_s13, %s68_s14  ;;  %p70_p8 = scmp.eq.s32.totalorder %s68_s14, 0 }
  0x1a   : > { %p128_p9 = scmp.eq.s32.totalorder %s127_s16, 0  ;;  %p140_p10 = scmp.ne.s32.totalorder %s976_s22, %s972_s21 }
  0x1b   : > { %p141_p11 = scmp.eq.s32.totalorder %s654_s30, 3  ;;  %p146_p13 = scmp.ne.s32.totalorder %s972_s21, %s968_s20 }
  0x1c   : > { %s1137_s17 = scalar_select %p70_p8, %s988_s25, %s72_s10  }
  0x1d   : > { %s1140_s18 = scalar_select %p128_p9, %s976_s22, %s130_s15  }
  0x1e   : > { %1324 = sst [smem:[#allocation18_spill]] %s1137_s17  ;;  %p1142_p12 = por %p141_p11, %p140_p10 }
  0x1f   : > { %p147_p0 = scmp.eq.s32.totalorder %s655_s6, 3  ;;  %p742_p1 = scmp.lt.s32.totalorder %s1008_s29, 4 }
  0x20   : > { %s202_s23 = sand.u32 1, %s988_s25   ;;  %s659_s30 = sshll.u32 %s1109_s9, 5 }
  0x21   : > { %p1150_p2 = por %p147_p0, %p146_p13  ;;  %s658_s14 = sshll.u32 %s202_s23, 6 }
  0x22   : > { %s211_s10 = sadd.s32 %s1004_s28, %s659_s30  ;;  %s206_s15 = scalar_lea.vmem [#allocation6], %s658_s14 }
  0x23   : > { %s660_s16 = sshll.u32 %s211_s10, 2  ;;  %s1156_s8 = sshll.u32 %s206_s15, 4  ;;  %s217_s8 = int_to_ptr.vmem [resolvable:$true] %s1156_s8 }
  0x24   : > { %s1327_s2 = sld [smem:[#allocation19_spill]]  ;;  %p1164_p3 = pnand %p742_p1, %p1119_p6 }
  0x25   : > { %p661_p4 = scmp.ge.s32.totalorder %s1008_s29, 1  ;;  %s203_s9 = scalar_lea.sflag [#allocation7], %s202_s23 }
  0x26   : > { %p860_p8 = pneg %p1164_p3 }
  0x2a   : > { %s213_s17 = scalar_lea.hbm %s1327_s2, %s660_s16  ;;  %s863_s11 = scalar_lea.hbm %s1327_s2, 256 }
  0x2b   : > { %s214_s6 = sshll.u32 %s213_s17, 4  ;;  %s215_s6 = int_to_ptr.hbm [resolvable:$true] %s214_s6 }
  0x2c   : > { %s856_s30 = sshra.s32 %s215_s6, 4  ;;  %s857_s30 = int_to_ptr.hbm [resolvable:$true] %s856_s30 }
  0x2d   : > { %s858_s14 = scalar_lea.hbm %s857_s30, 64  ;;  %p864_p6 = scmp.lt.s32.totalorder %s857_s30, %s1327_s2 }
  0x2e   : > { %p859_p5 = scmp.ne.s32.totalorder %s857_s30, %s858_s14  ;;  %p865_p11 = scmp.lt.s32.totalorder %s863_s11, %s858_s14 }
  0x30   : > { %p861_p9 = pnand %p860_p8, %p859_p5  ;;  %p866_p13 = por %p865_p11, %p864_p6 }
  0x32   : > { %p862_p10 = pneg %p861_p9 }
  0x34   : > { %p867_p0 = pnand %p866_p13, %p862_p10 }
  0x36   : > { %870 = shalt.err (!%p867_p0)
}
  0x37   : > { %s1010_s23 = smov 128   ;;  %s1011_s16 = smov 64  }
  0x38   : > { %s1012_s15 = smov 4   ;;  %p236_p1 = scmp.lt.s32.totalorder %s1008_s29, 5 }
  0x39   : > { %737 = dma.hbm_to_vmem [thread:$0]  (!%p1164_p3), %s215_s6, 1024, %s217_s8, %s203_s9, %s1010_s23, %s1011_s16, %s1012_s15  }
  0x3a   : > { %p237_p5 = pnand %p661_p4, %p236_p1 }
  0x3b   : > { %s242_s0 = sand.u32 (!%p237_p5), 1, %s984_s24  }
  0x3c   : > { %240 = sbr.rel (%p237_p5) target bundleno = 648 (0x288), region = 32  ;;  %s662_s30 = sshll.u32 (!%p237_p5), %s242_s0, 6 }
  0x3d   : > { %s243_s14 = scalar_lea.sflag (!%p237_p5), [#allocation7], %s242_s0  ;;  %s1183_s7 = scalar_lea.vmem (!%p237_p5), [#allocation6], %s662_s30 }
  0x41   : > { %959 = dma.done.wait (%p1125_p7), %s243_s14, 1024  }
  0x42   : > { %961 = vsyncadd (%p1125_p7), %s243_s14, 4294966272  ;;  %p300_p3 = scmp.lt.s32.totalorder %s996_s27, 1  ;;  %s1312_s25 = sand.u32 1, %s972_s21  }
  0x43   : > { %s297_s8 = sld [smem:[#allocation5]]  ;;  %s1193_s6 = sshll.u32 %s1312_s25, 3 }
  0x44   : > { %s664_s9 = sshll.u32 %s992_s26, 1  ;;  %p669_p7 = scmp.ne.s32.totalorder %s996_s27, 0 }
  0x45   : > { %p291_p4 = scmp.lt.s32.totalorder %s664_s9, 3 }
  0x46   : > { %s301_s11 = scalar_select %p300_p3, %s996_s27, 1 }
  0x47   : > { %s1347_s9 = smov (!%p291_p4, %s664_s9), 3 }
  0x48   : > { %s665_s17 = sshll.u32 %s1347_s9, 2  ;;  %s668_s12 = sshll.u32 %s1347_s9, 3 }
  0x49   : > { %p298_p8 = scmp.lt.s32.totalorder %s297_s8, 1  ;;  %s1200_s16 = scalar_lea.vmem %s1303_s1, %s665_s17 }
  0x4a   : > { %s1205_s30 = scalar_lea.vmem %s1307_s5, %s668_s12  ;;  %s282_s9 = scalar_lea.vmem [#allocation9], %s1193_s6 }
  0x4b   : > { %s1349_s8 = smov (!%p298_p8, %s297_s8), 1  ;;  %316 = sbr.rel (%p669_p7) target bundleno = 85 (0x55), region = 40 }
  0x4c   : > { %s666_s14 = sshll.u32 %s1349_s8, 1  ;;  %s670_s17 = sshll.u32 (!%p669_p7), %s992_s26, 4 }
  0x4d   : > { %s1207_s25 = sadd.s32 %s666_s14, %s301_s11  ;;  %s318_s10 = scalar_lea.vmem (!%p669_p7), [#allocation2], %s670_s17 }
  0x4e   : > { %s304_s24 = scalar_lea.vmem %s1305_s3, %s1207_s25  ;;  %s322_s12 = scalar_lea.vmem (!%p669_p7), [#allocation3], %s670_s17 }
  0x50   : > { %vm319_vm0 = vcmask 7168   ;;  %v1013_v0 = vmov -1e+30   ;;  %v1014_v1 = vmov 0.0  }
  0x51   : > { %320 = vst.msk [vmem:[%s318_s10] sm:$0xff] %vm319_vm0, %v1013_v0 }
  0x52   : > { %321 = vst.msk [vmem:[%s318_s10 + $0x8] sm:$0xff] %vm319_vm0, %v1013_v0 }
  0x53   : > { %323 = vst.msk [vmem:[%s322_s12] sm:$0xff] %vm319_vm0, %v1014_v1 }
  0x54   : > { %324 = vst.msk [vmem:[%s322_s12 + $0x8] sm:$0xff] %vm319_vm0, %v1014_v1 }
  0x55 PF: > { %v723_v2 = vld [vmem:[%s1183_s7 + $0x38] sm:$0xff]  ;;  %v722_v3 = vld [vmem:[%s1183_s7 + $0x30] sm:$0xff]  ;;  %v721_v4 = vld [vmem:[%s1183_s7 + $0x28] sm:$0xff]  ;;  %v1015_v17 = vmov 0   ;;  %vm462_vm1 = vcmask 7168   ;;  %p708_p9 = scmp.ne.s32.totalorder %s996_s27, 1 }
  0x56   : > { %401 = vmatpush.bf16.msra.mxu0 %v723_v2  ;;  %v720_v5 = vld [vmem:[%s1183_s7 + $0x20] sm:$0xff]  ;;  %v719_v6 = vld [vmem:[%s1183_s7 + $0x18] sm:$0xff]  ;;  %v718_v7 = vld [vmem:[%s1183_s7 + $0x10] sm:$0xff]  ;;  %841 = vset.pattern.permute.xlu1 %v1015_v17 }
  0x57   : > { %v717_v8 = vld [vmem:[%s1183_s7 + $0x8] sm:$0xff]  ;;  %v716_v9 = vld [vmem:[%s1183_s7] sm:$0xff]  ;;  %842 = vset.pattern.permute.xlu0 %v1015_v17  ;;  %s707_s7 = sshll.u32 %s992_s26, 4 }
  0x58   : > { %v715_v10 = vld [vmem:[%s1200_s16] sm:$0xff]  ;;  %s420_s8 = scalar_lea.vmem [#allocation2], %s707_s7 }
  0x59   : > { %v843_v11 = vld [vmem:[%s304_s24] ss:$0 sm:$0xff]  ;;  %v422_v22 = vld [vmem:[%s420_s8 + $0x8] sm:$0xff]  ;;  %s423_s24 = scalar_lea.vmem [#allocation3], %s707_s7 }
  0x5a   : > { %402 = vmatpush.bf16.msra.mxu0 %v722_v3  ;;  %v421_v18 = vld [vmem:[%s420_s8] sm:$0xff] }
  0x5b   : > { %v424_v37 = vld [vmem:[%s423_s24] sm:$0xff]  ;;  %v425_v42 = vld [vmem:[%s423_s24 + $0x8] sm:$0xff] }
  0x5e   : > { %403 = vmatpush.bf16.msra.mxu0 %v721_v4 }
  0x62   : > { %404 = vmatpush.bf16.msra.mxu0 %v720_v5 }
  0x66   : > { %405 = vmatpush.bf16.msra.mxu0 %v719_v6 }
  0x6a   : > { %406 = vmatpush.bf16.msra.mxu0 %v718_v7 }
  0x6e   : > { %407 = vmatpush.bf16.msra.mxu0 %v717_v8 }
  0x72   : > { %408 = vmatpush.bf16.msra.mxu0 %v716_v9 }
  0x75   : > { %409 = vmatmul.bf16.vlgmr.msra.gmra.mxu0 %v715_v10 }
  0xf2   : > { %v410_v12 = vpop.f32.mrf.mxu0 }
  0xf3   : > { %v411_v13 = vadd.f32 %v843_v11, %v410_v12 }
  0xf5   : > { %426 = vmax.xlane.f32.xlu0 %v411_v13 }
  0xfa   : > { %v412_v14 = vpop.f32.mrf.mxu0 }
  0xfb   : > { %v413_v15 = vadd.f32 %v843_v11, %v412_v14 }
  0xfd   : > { %v728_v16 = vpack.c.bf16 %v413_v15, %v411_v13  ;;  %428 = vmax.xlane.f32.xlu0 %v413_v15 }
  0xff   : > { %729 = vst [vmem:[%s282_s9] sm:$0xff] %v728_v16  }
 0x168   : > { %v427_v19 = vpop.xlane.xlu0 %426 }
 0x169   : > { %v430_v20 = vmax.f32 %v421_v18, %v427_v19 }
 0x16b   : > { %v432_v21 = vsub.f32 %v421_v18, %v430_v20  ;;  %463 = vst.msk [vmem:[%s420_s8] sm:$0xff] %vm462_vm1, %v430_v20  ;;  %442 = vperm.xlu1 %841, %v430_v20  }
 0x16d   : > { %v434_v34 = vmul.f32 1.442695, %v432_v21 }
 0x170   : > { %v429_v23 = vpop.xlane.xlu0 %428 }
 0x171   : > { %v431_v24 = vmax.f32 %v422_v22, %v429_v23 }
 0x173   : > { %v433_v25 = vsub.f32 %v422_v22, %v431_v24  ;;  %464 = vst.msk [vmem:[%s420_s8 + $0x8] sm:$0xff] %vm462_vm1, %v431_v24  ;;  %447 = vperm.xlu1 %841, %v431_v24  }
 0x175   : > { %v436_v35 = vmul.f32 1.442695, %v433_v25 }
 0x1dd   : > { %v443_v26 = vpop.permute.xlu1 %442 }
 0x1de   : > { %v450_v27 = vsub.f32 %v411_v13, %v443_v26 }
 0x1e0   : > { %v452_v28 = vmul.f32 1.442695, %v450_v27 }
 0x1e2   : > { %844 = vpow2.f32 %v452_v28 }
 0x1e5   : > { %v448_v29 = vpop.permute.xlu1 %447 }
 0x1e6   : > { %v451_v30 = vsub.f32 %v413_v15, %v448_v29 }
 0x1e8   : > { %v845_v31 = vpop.eup %844  ;;  %v454_v32 = vmul.f32 1.442695, %v451_v30 }
 0x1e9   : > { %456 = vadd.xlane.f32.xlu2 %v845_v31 }
 0x1ea   : > { %846 = vpow2.f32 %v454_v32 }
 0x1eb   : > { %848 = vpow2.f32 %v434_v34 }
 0x1ec   : > { %850 = vpow2.f32 %v436_v35 }
 0x1f0   : > { %v847_v33 = vpop.eup %846 }
 0x1f1   : > { %458 = vadd.xlane.f32.xlu2 %v847_v33  ;;  %v849_v36 = vpop.eup %848 }
 0x1f2   : > { %v438_v38 = vmul.f32 %v849_v36, %v424_v37  ;;  %v851_v41 = vpop.eup %850 }
 0x1f3   : > { %v439_v43 = vmul.f32 %v851_v41, %v425_v42 }
 0x25c   : > { %v457_v39 = vpop.xlane.xlu2 %456 }
 0x25d   : > { %v460_v40 = vadd.f32 %v457_v39, %v438_v38 }
 0x25f   : > { %465 = vst.msk [vmem:[%s423_s24] sm:$0xff] %vm462_vm1, %v460_v40 }
 0x263   : > { %470 = sbr.rel (%p708_p9) target bundleno = 629 (0x275), region = 44 }
 0x264   : > { %v459_v44 = vpop.xlane.xlu2 %458 }
 0x265   : > { %v461_v45 = vadd.f32 %v459_v44, %v439_v43 }
 0x267   : > { %466 = vst.msk [vmem:[%s423_s24 + $0x8] sm:$0xff] %vm462_vm1, %v461_v45 }
 0x268   : > { %852 = vlog2.f32 %v460_v40 }
 0x269   : > { %854 = vlog2.f32 %v461_v45 }
 0x26e   : > { %v853_v46 = vpop.eup %852 }
 0x26f   : > { %v855_v47 = vpop.eup %854  ;;  %v472_v48 = vmul.f32 0.6931472, %v853_v46 }
 0x270   : > { %v474_v49 = vmul.f32 0.6931472, %v855_v47 }
 0x271   : > { %v475_v50 = vadd.f32 %v472_v48, %v430_v20 }
 0x272   : > { %v476_v51 = vadd.f32 %v474_v49, %v431_v24 }
 0x273   : > { %477 = vst.msk [vmem:[%s1205_s30] sm:$0xff] %vm462_vm1, %v475_v50 }
 0x274   : > { %478 = vst.msk [vmem:[%s1205_s30 + $0x8] sm:$0xff] %vm462_vm1, %v476_v51 }
 0x275 PF: > { %s724_s25 = sshll.u32 %s992_s26, 2  ;;  %s499_s23 = sshll.u32 %s282_s9, 4  ;;  %s500_s23 = int_to_ptr.vmem [resolvable:$true] %s499_s23 }
 0x276   : > { %s496_s11 = sadd.s32 %s996_s27, %s724_s25  ;;  %s1329_s10 = sand.u32 1, %s972_s21  }
 0x277   : > { %s712_s16 = sshll.u32 %s496_s11, 2  ;;  %s480_s30 = scalar_lea.sflag [#allocation8], %s1329_s10 }
 0x278   : > { %s498_s14 = scalar_lea.hbm %s1306_s4, %s712_s16  ;;  %s906_s6 = scalar_lea.hbm %s1306_s4, 32 }
 0x279   : > { %s501_s17 = sshll.u32 %s498_s14, 4  ;;  %s502_s17 = int_to_ptr.hbm [resolvable:$true] %s501_s17 }
 0x27a   : > { %s900_s12 = sshra.s32 %s502_s17, 4  ;;  %s901_s12 = int_to_ptr.hbm [resolvable:$true] %s900_s12 }
 0x27b   : > { %s902_s2 = scalar_lea.hbm %s901_s12, 8  ;;  %p907_p13 = scmp.lt.s32.totalorder %s901_s12, %s1306_s4 }
 0x27c   : > { %p903_p10 = scmp.ne.s32.totalorder %s901_s12, %s902_s2  ;;  %p908_p0 = scmp.lt.s32.totalorder %s906_s6, %s902_s2 }
 0x27e   : > { %p904_p6 = pnand %p903_p10, %p1142_p12  ;;  %p909_p1 = por %p908_p0, %p907_p13 }
 0x280   : > { %p905_p11 = pneg %p904_p6 }
 0x282   : > { %p910_p5 = pnand %p909_p1, %p905_p11 }
 0x284   : > { %913 = shalt.err (!%p910_p5)
}
 0x285   : > { %s1016_s7 = smov 64   ;;  %s1017_s8 = smov 128  }
 0x286   : > { %s1018_s24 = smov 4  }
 0x287   : > { %732 = dma.vmem_to_hbm [thread:$0]  (%p1142_p12), %s500_s23, 128, %s502_s17, %s480_s30, %s1016_s7, %s1017_s8, %s1018_s24  }
 0x288 PF: > { %p743_p3 = scmp.ge.s32.totalorder %s1008_s29, 2  ;;  %s520_s25 = sand.u32 1, %s968_s20  }
 0x289   : > { %s521_s11 = scalar_lea.sflag [#allocation8], %s520_s25 }
 0x28a   : > { %p739_p4 = pnand %p743_p3, %p1150_p2 }
 0x28c   : > { %p740_p8 = pneg %p739_p4 }
 0x28e   : > { %963 = dma.done.wait (%p740_p8), %s521_s11, 128  }
 0x28f   : > { %965 = vsyncadd (%p740_p8), %s521_s11, 4294967168  ;;  %s23_s29 = sadd.s32 1, %s1008_s29   ;;  %s1330_s23 = sld [smem:[#allocation12_spill]] }
 0x290   : > { %p20_p7 = scmp.ge.s32.totalorder %s23_s29, 6   ;;  %s1331_s24 = sld [smem:[#allocation13_spill]] }
 0x291   : > { %s1332_s25 = sld [smem:[#allocation18_spill]]  ;;  %s1337_s20 = smov %s972_s21 }
 0x292   : > { %s1333_s26 = sld [smem:[#allocation14_spill]]  ;;  %s1338_s21 = smov %s976_s22 }
 0x293   : > { %s1334_s27 = sld [smem:[#allocation15_spill]]  ;;  %s1339_s22 = smov %s1140_s18 }
 0x294   : > { %s1335_s0 = sld [smem:[#allocation16_spill]]  ;;  %22 = sbr.rel (!%p20_p7) target bundleno = 12 (0xc), region = 107 }
 0x295   : > { %s1336_s28 = sld [smem:[#allocation17_spill]] }
 0x299   :  { %535 = vsyncpa [#allocation7], 1 }
 0x29a   :  { %537 = vsyncpa [#allocation7 + $0x1], 1 }
 0x29b   :  { %538 = vsyncpa [#allocation8], 1 }
 0x29c   :  { %540 = vsyncpa [#allocation8 + $0x1], 1 }

</bundles_post_ra>
